<compile_context>
chip_gen: v6e
topology: v6e:2x2x1
jax: 0.10.0
libtpu: 0.0.40
codegen_flags: <defaults>
</compile_context>

<pallas_src>
import functools

import jax
import jax.numpy as jnp
from jax.experimental import pallas as pl
from jax.experimental.pallas import tpu as pltpu


# ----------------------------------------------------------------------------
# Kernel 1: K / V projection — each key/value row projected exactly once.
# ----------------------------------------------------------------------------
def kv_projection_kernel(k_ref, v_ref, wk_ref, bk_ref, wv_ref, bv_ref,
                         kp_ref, vp_ref):
    # k_ref / v_ref: (tkv, d_in) f32 activations; wk/wv already bf16;
    # biases f32.  MXU runs bf16 x bf16 -> f32 accumulate; bias add in f32;
    # results stored bf16 (halves HBM traffic for the attention kernel).
    k_bf = k_ref[...].astype(jnp.bfloat16)
    v_bf = v_ref[...].astype(jnp.bfloat16)
    kp = jnp.dot(k_bf, wk_ref[...], preferred_element_type=jnp.float32) + bk_ref[...]
    vp = jnp.dot(v_bf, wv_ref[...], preferred_element_type=jnp.float32) + bv_ref[...]
    kp_ref[...] = kp.astype(kp_ref.dtype)
    vp_ref[...] = vp.astype(vp_ref.dtype)


def project_kv(key, value, wk_bf, bk2, wv_bf, bv2, *, tkv):
    B, Sk, d_in = key.shape
    d_k = wk_bf.shape[1]
    return pl.pallas_call(
        kv_projection_kernel,
        out_shape=(jax.ShapeDtypeStruct((B, Sk, d_k), jnp.bfloat16),
                   jax.ShapeDtypeStruct((B, Sk, d_k), jnp.bfloat16)),
        grid_spec=pltpu.PrefetchScalarGridSpec(
            num_scalar_prefetch=0,
            grid=(B, Sk // tkv),
            in_specs=[
                pl.BlockSpec((None, tkv, d_in), lambda b, i: (b, i, 0)),  # key
                pl.BlockSpec((None, tkv, d_in), lambda b, i: (b, i, 0)),  # value
                pl.BlockSpec((d_in, d_k), lambda b, i: (0, 0)),           # Wk (bf16)
                pl.BlockSpec((1, d_k), lambda b, i: (0, 0)),              # bk
                pl.BlockSpec((d_in, d_k), lambda b, i: (0, 0)),           # Wv (bf16)
                pl.BlockSpec((1, d_k), lambda b, i: (0, 0)),              # bv
            ],
            out_specs=[
                pl.BlockSpec((None, tkv, d_k), lambda b, i: (b, i, 0)),
                pl.BlockSpec((None, tkv, d_k), lambda b, i: (b, i, 0)),
            ],
        ),
        compiler_params=pltpu.CompilerParams(
            dimension_semantics=("parallel", "parallel"),
            vmem_limit_bytes=48 * 1024 * 1024,
        ),
    )(key, value, wk_bf, bk2, wv_bf, bv2)


# ----------------------------------------------------------------------------
# Kernel 2: fused Q projection + flash-style online-softmax attention.
# ----------------------------------------------------------------------------
def attention_head_kernel(q_ref, kp_ref, vp_ref, wq_ref, bq_ref,
                          o_ref,
                          qproj_ref, m_ref, l_ref, acc_ref,
                          *, inv_scale):
    # q_ref:   (tq, d_in) f32     kp_ref/vp_ref: (tk, d_k) bf16 (pre-projected)
    # wq_ref:  (d_in, d_q) bf16   bq_ref: (1, d_q) f32
    # scratch: qproj (tq, d_q) bf16, m/l (tq, 1) f32, acc (tq, d_k) f32
    ki = pl.program_id(2)

    @pl.when(ki == 0)
    def _init():
        # Project q once per (batch, q-tile); bf16 operands, f32 accumulate.
        qp = (jnp.dot(q_ref[...].astype(jnp.bfloat16), wq_ref[...],
                      preferred_element_type=jnp.float32)
              + bq_ref[...])
        # Fold the 1/sqrt(dim_q) softmax scale here (tq x d_q multiplies once
        # per q-tile) instead of a (tq x tk) multiply on every k step.
        qproj_ref[...] = (qp * inv_scale).astype(qproj_ref.dtype)
        m_ref[...] = jnp.full(m_ref.shape, -jnp.inf, dtype=m_ref.dtype)
        l_ref[...] = jnp.zeros(l_ref.shape, dtype=l_ref.dtype)
        acc_ref[...] = jnp.zeros(acc_ref.shape, dtype=acc_ref.dtype)

    # Scaled scores: (tq, tk) = (scaled q_proj) @ k_proj^T, bf16 -> f32 acc.
    s = jax.lax.dot_general(
        qproj_ref[...], kp_ref[...],
        dimension_numbers=(((1,), (1,)), ((), ())),
        preferred_element_type=jnp.float32)

    # Online softmax update (single pass over k tiles), all f32 element-wise.
    m_prev = m_ref[...]
    m_new = jnp.maximum(m_prev, jnp.max(s, axis=-1, keepdims=True))
    alpha = jnp.exp(m_prev - m_new)
    p = jnp.exp(s - m_new)
    l_ref[...] = alpha * l_ref[...] + jnp.sum(p, axis=-1, keepdims=True)
    acc_ref[...] = alpha * acc_ref[...] + jnp.dot(
        p.astype(jnp.bfloat16), vp_ref[...], preferred_element_type=jnp.float32)
    m_ref[...] = m_new

    @pl.when(ki == pl.num_programs(2) - 1)
    def _finalize():
        o_ref[...] = (acc_ref[...] *
                      pl.reciprocal(l_ref[...], approx=True)).astype(o_ref.dtype)


def attention_head_forward(query, key, value, wq, bq, wk, bk, wv, bv,
                           *, tq=256, tk=256, tkv=256):
    """query:(B,Sq,d_in), key/value:(B,Sk,d_in); weights stored as (in, out).

    Tile guidance: v6e/v7x -> tq=256, tk=256-512 (re-check VMEM on v7x);
    v5e -> 128-256 (4x128^2 MXU already saturated at 128 rows).
    """
    B, Sq, d_in = query.shape
    _, Sk, _ = key.shape
    d_q = wq.shape[1]
    d_k = wk.shape[1]
    assert d_q == d_k, "bmm(q, k^T) requires dim_q == dim_k"

    tq = min(tq, Sq)
    tk = min(tk, Sk)
    tkv = min(tkv, Sk)
    # TODO(synk): ragged / non-multiple sequence lengths would need pl.cdiv
    # grids + masked final tiles; demo shapes tile evenly.
    assert Sq % tq == 0 and Sk % tk == 0 and Sk % tkv == 0

    inv_scale = 1.0 / (float(d_q) ** 0.5)

    # Weights cast to bf16 once in the wrapper (native MXU operands, half the
    # weight DMA); biases stay f32 and are added post-accumulation.
    wq_bf = wq.astype(jnp.bfloat16)
    wk_bf = wk.astype(jnp.bfloat16)
    wv_bf = wv.astype(jnp.bfloat16)
    bq2 = bq.reshape(1, d_q).astype(jnp.float32)
    bk2 = bk.reshape(1, d_k).astype(jnp.float32)
    bv2 = bv.reshape(1, d_k).astype(jnp.float32)

    # Pre-project K and V exactly once per row (bf16 in HBM).
    k_proj, v_proj = project_kv(key, value, wk_bf, bk2, wv_bf, bv2, tkv=tkv)

    kernel = functools.partial(attention_head_kernel, inv_scale=inv_scale)

    out = pl.pallas_call(
        kernel,
        out_shape=jax.ShapeDtypeStruct((B, Sq, d_q), query.dtype),
        grid_spec=pltpu.PrefetchScalarGridSpec(
            num_scalar_prefetch=0,
            grid=(B, Sq // tq, Sk // tk),
            in_specs=[
                pl.BlockSpec((None, tq, d_in), lambda b, qi, ki: (b, qi, 0)),  # query
                pl.BlockSpec((None, tk, d_q), lambda b, qi, ki: (b, ki, 0)),   # k_proj
                pl.BlockSpec((None, tk, d_k), lambda b, qi, ki: (b, ki, 0)),   # v_proj
                # Constant-index weight/bias blocks: DMA'd once, stay resident.
                pl.BlockSpec((d_in, d_q), lambda b, qi, ki: (0, 0)),           # Wq (bf16)
                pl.BlockSpec((1, d_q), lambda b, qi, ki: (0, 0)),              # bq
            ],
            out_specs=pl.BlockSpec((None, tq, d_q), lambda b, qi, ki: (b, qi, 0)),
            scratch_shapes=[
                pltpu.VMEM((tq, d_q), jnp.bfloat16),  # projected+scaled q tile
                pltpu.VMEM((tq, 1), jnp.float32),     # running max
                pltpu.VMEM((tq, 1), jnp.float32),     # running denom
                pltpu.VMEM((tq, d_k), jnp.float32),   # output accumulator
            ],
        ),
        compiler_params=pltpu.CompilerParams(
            dimension_semantics=("parallel", "parallel", "arbitrary"),
            vmem_limit_bytes=48 * 1024 * 1024,   # headroom on v7x (64 MiB phys)
        ),
    )(query, k_proj, v_proj, wq_bf, bq2)

    return out


def attention_head_ref(query, key, value, wq, bq, wk, bk, wv, bv):
    hp = jax.lax.Precision.HIGHEST
    q = jnp.einsum("bsd,de->bse", query, wq, precision=hp) + bq
    k = jnp.einsum("bsd,de->bse", key, wk, precision=hp) + bk
    v = jnp.einsum("bsd,de->bse", value, wv, precision=hp) + bv
    scale = q.shape[-1] ** 0.5
    logits = jnp.einsum("bqe,bke->bqk", q, k, precision=hp) / scale
    probs = jax.nn.softmax(logits, axis=-1)
    return jnp.einsum("bqk,bke->bqe", probs, v, precision=hp)


if __name__ == "__main__":
    # Small but lane-dense shapes (multiples of 128); B=2 keeps both v7x
    # TensorCores busy, Sk=512 exercises two online-softmax k steps.
    B, Sq, Sk = 2, 256, 512
    D_IN, D_QK = 128, 128   # dim_in, dim_q == dim_k

    key0 = jax.random.PRNGKey(0)
    ks = jax.random.split(key0, 9)

    query = jax.random.normal(ks[0], (B, Sq, D_IN), dtype=jnp.float32)
    key_t = jax.random.normal(ks[1], (B, Sk, D_IN), dtype=jnp.float32)
    value = jax.random.normal(ks[2], (B, Sk, D_IN), dtype=jnp.float32)

    w_scale = 1.0 / (D_IN ** 0.5)
    wq = jax.random.normal(ks[3], (D_IN, D_QK), dtype=jnp.float32) * w_scale
    wk = jax.random.normal(ks[4], (D_IN, D_QK), dtype=jnp.float32) * w_scale
    wv = jax.random.normal(ks[5], (D_IN, D_QK), dtype=jnp.float32) * w_scale
    bq = jax.random.normal(ks[6], (D_QK,), dtype=jnp.float32) * 0.01
    bk = jax.random.normal(ks[7], (D_QK,), dtype=jnp.float32) * 0.01
    bv = jax.random.normal(ks[8], (D_QK,), dtype=jnp.float32) * 0.01

    out = attention_head_forward(query, key_t, value, wq, bq, wk, bk, wv, bv)
    out = jax.block_until_ready(out)

    ref = attention_head_ref(query, key_t, value, wq, bq, wk, bk, wv, bv)
    assert out.shape == (B, Sq, D_QK)
    max_err = jnp.max(jnp.abs(out - ref))
    # Tolerance reflects bf16 MXU operands (vs. a Precision.HIGHEST f32
    # reference); observed error is well inside this.
    assert jnp.allclose(out, ref, atol=2e-2, rtol=2e-2), (
        f"mismatch vs reference (max abs err = {max_err})")

    print("KERNEL_OK")
</pallas_src>

<mosaic_0001>
module attributes {stable_mosaic.version = 11 : i64} {
  func.func @kv_projection_kernel(%arg0: i32, %arg1: i32, %arg2: memref<1x256x128xf32, #tpu.memory_space<vmem>>, %arg3: memref<1x256x128xf32, #tpu.memory_space<vmem>>, %arg4: memref<128x128xbf16, #tpu.memory_space<vmem>>, %arg5: memref<1x128xf32, #tpu.memory_space<vmem>>, %arg6: memref<128x128xbf16, #tpu.memory_space<vmem>>, %arg7: memref<1x128xf32, #tpu.memory_space<vmem>>, %arg8: memref<1x256x128xbf16, #tpu.memory_space<vmem>>, %arg9: memref<1x256x128xbf16, #tpu.memory_space<vmem>>) attributes {dimension_semantics = [#tpu.dimension_semantics<parallel>, #tpu.dimension_semantics<parallel>], iteration_bounds = array<i64: 2, 2>, scalar_prefetch = 0 : i64, scratch_operands = 0 : i64, tpu.core_type = #tpu.core_type<tc>, window_params = [{transform_indices = @transform_0, window_bounds = array<i64: 1, 256, 128>}, {transform_indices = @transform_1, window_bounds = array<i64: 1, 256, 128>}, {pipeline_mode = #tpu.pipeline_mode<synchronous>, transform_indices = @transform_2, window_bounds = array<i64: 128, 128>}, {pipeline_mode = #tpu.pipeline_mode<synchronous>, transform_indices = @transform_3, window_bounds = array<i64: 1, 128>}, {pipeline_mode = #tpu.pipeline_mode<synchronous>, transform_indices = @transform_4, window_bounds = array<i64: 128, 128>}, {pipeline_mode = #tpu.pipeline_mode<synchronous>, transform_indices = @transform_5, window_bounds = array<i64: 1, 128>}, {transform_indices = @transform_6, window_bounds = array<i64: 1, 256, 128>}, {transform_indices = @transform_7, window_bounds = array<i64: 1, 256, 128>}]} {
    %c0 = arith.constant 0 : index
    %c0_0 = arith.constant 0 : index
    %c0_1 = arith.constant 0 : index
    %0 = vector.load %arg2[%c0, %c0_0, %c0_1] : memref<1x256x128xf32, #tpu.memory_space<vmem>>, vector<1x256x128xf32>
    %1 = vector.shape_cast %0 : vector<1x256x128xf32> to vector<256x128xf32>
    %2 = arith.truncf %1 : vector<256x128xf32> to vector<256x128xbf16>
    %c0_2 = arith.constant 0 : index
    %c0_3 = arith.constant 0 : index
    %c0_4 = arith.constant 0 : index
    %3 = vector.load %arg3[%c0_2, %c0_3, %c0_4] : memref<1x256x128xf32, #tpu.memory_space<vmem>>, vector<1x256x128xf32>
    %4 = vector.shape_cast %3 : vector<1x256x128xf32> to vector<256x128xf32>
    %5 = arith.truncf %4 : vector<256x128xf32> to vector<256x128xbf16>
    %c0_5 = arith.constant 0 : index
    %c0_6 = arith.constant 0 : index
    %6 = vector.load %arg4[%c0_5, %c0_6] : memref<128x128xbf16, #tpu.memory_space<vmem>>, vector<128x128xbf16>
    %cst = arith.constant dense<0.000000e+00> : vector<256x128xf32>
    %7 = tpu.matmul %2, %6, %cst {dimension_numbers = #tpu.dot_dimension_numbers<[1], [0], [0], [1], [0, 0, 1, 1], [], []>} : vector<256x128xbf16>, vector<128x128xbf16>, vector<256x128xf32> -> vector<256x128xf32>
    %c0_7 = arith.constant 0 : index
    %c0_8 = arith.constant 0 : index
    %8 = vector.load %arg5[%c0_7, %c0_8] : memref<1x128xf32, #tpu.memory_space<vmem>>, vector<1x128xf32>
    %9 = vector.broadcast %8 : vector<1x128xf32> to vector<256x128xf32>
    %10 = arith.addf %7, %9 : vector<256x128xf32>
    %c0_9 = arith.constant 0 : index
    %c0_10 = arith.constant 0 : index
    %11 = vector.load %arg6[%c0_9, %c0_10] : memref<128x128xbf16, #tpu.memory_space<vmem>>, vector<128x128xbf16>
    %cst_11 = arith.constant dense<0.000000e+00> : vector<256x128xf32>
    %12 = tpu.matmul %5, %11, %cst_11 {dimension_numbers = #tpu.dot_dimension_numbers<[1], [0], [0], [1], [0, 0, 1, 1], [], []>} : vector<256x128xbf16>, vector<128x128xbf16>, vector<256x128xf32> -> vector<256x128xf32>
    %c0_12 = arith.constant 0 : index
    %c0_13 = arith.constant 0 : index
    %13 = vector.load %arg7[%c0_12, %c0_13] : memref<1x128xf32, #tpu.memory_space<vmem>>, vector<1x128xf32>
    %14 = vector.broadcast %13 : vector<1x128xf32> to vector<256x128xf32>
    %15 = arith.addf %12, %14 : vector<256x128xf32>
    %16 = arith.truncf %10 : vector<256x128xf32> to vector<256x128xbf16>
    %c0_14 = arith.constant 0 : index
    %c0_15 = arith.constant 0 : index
    %c0_16 = arith.constant 0 : index
    %17 = vector.load %arg8[%c0_14, %c0_15, %c0_16] : memref<1x256x128xbf16, #tpu.memory_space<vmem>>, vector<1x256x128xbf16>
    %18 = vector.shape_cast %17 : vector<1x256x128xbf16> to vector<256x128xbf16>
    %19 = vector.shape_cast %16 : vector<256x128xbf16> to vector<1x256x128xbf16>
    tpu.vector_store %arg8[%c0_14, %c0_15, %c0_16], %19 {strides = array<i32>} : memref<1x256x128xbf16, #tpu.memory_space<vmem>>, vector<1x256x128xbf16>,
    %20 = arith.truncf %15 : vector<256x128xf32> to vector<256x128xbf16>
    %c0_17 = arith.constant 0 : index
    %c0_18 = arith.constant 0 : index
    %c0_19 = arith.constant 0 : index
    %21 = vector.load %arg9[%c0_17, %c0_18, %c0_19] : memref<1x256x128xbf16, #tpu.memory_space<vmem>>, vector<1x256x128xbf16>
    %22 = vector.shape_cast %21 : vector<1x256x128xbf16> to vector<256x128xbf16>
    %23 = vector.shape_cast %20 : vector<256x128xbf16> to vector<1x256x128xbf16>
    tpu.vector_store %arg9[%c0_17, %c0_18, %c0_19], %23 {strides = array<i32>} : memref<1x256x128xbf16, #tpu.memory_space<vmem>>, vector<1x256x128xbf16>,
    return
  }
  func.func @transform_0(%arg0: i32, %arg1: i32) -> (i32, i32, i32) {
    %c0_i32 = arith.constant 0 : i32
    %c0_i32_0 = arith.constant 0 : i32
    return %arg0, %arg1, %c0_i32 : i32, i32, i32
  }
  func.func @transform_1(%arg0: i32, %arg1: i32) -> (i32, i32, i32) {
    %c0_i32 = arith.constant 0 : i32
    %c0_i32_0 = arith.constant 0 : i32
    return %arg0, %arg1, %c0_i32 : i32, i32, i32
  }
  func.func @transform_2(%arg0: i32, %arg1: i32) -> (i32, i32) {
    %c0_i32 = arith.constant 0 : i32
    %c0_i32_0 = arith.constant 0 : i32
    %c0_i32_1 = arith.constant 0 : i32
    return %c0_i32, %c0_i32_0 : i32, i32
  }
  func.func @transform_3(%arg0: i32, %arg1: i32) -> (i32, i32) {
    %c0_i32 = arith.constant 0 : i32
    %c0_i32_0 = arith.constant 0 : i32
    %c0_i32_1 = arith.constant 0 : i32
    return %c0_i32, %c0_i32_0 : i32, i32
  }
  func.func @transform_4(%arg0: i32, %arg1: i32) -> (i32, i32) {
    %c0_i32 = arith.constant 0 : i32
    %c0_i32_0 = arith.constant 0 : i32
    %c0_i32_1 = arith.constant 0 : i32
    return %c0_i32, %c0_i32_0 : i32, i32
  }
  func.func @transform_5(%arg0: i32, %arg1: i32) -> (i32, i32) {
    %c0_i32 = arith.constant 0 : i32
    %c0_i32_0 = arith.constant 0 : i32
    %c0_i32_1 = arith.constant 0 : i32
    return %c0_i32, %c0_i32_0 : i32, i32
  }
  func.func @transform_6(%arg0: i32, %arg1: i32) -> (i32, i32, i32) {
    %c0_i32 = arith.constant 0 : i32
    %c0_i32_0 = arith.constant 0 : i32
    return %arg0, %arg1, %c0_i32 : i32, i32, i32
  }
  func.func @transform_7(%arg0: i32, %arg1: i32) -> (i32, i32, i32) {
    %c0_i32 = arith.constant 0 : i32
    %c0_i32_0 = arith.constant 0 : i32
    return %arg0, %arg1, %c0_i32 : i32, i32, i32
  }
}

</mosaic_0001>

<bundles_post_ra>
// kernel: tpu_custom_call.1
= control target key start
LH: loop header
LB: loop body
LE: loop exit
PB: predicated region body
PF: predicated region fallthrough
CT: control target
= control target key end

     0   :  { %s2895_s0 = inlined_call_operand.hbm [shape: f32[2,512,128], index: 0, kind: input, shape index: {}]   ;;  %s2896_s1 = inlined_call_operand.hbm [shape: f32[2,512,128], index: 1, kind: input, shape index: {}]   ;;  %s2897_s2 = inlined_call_operand.hbm [shape: bf16[128,128], index: 2, kind: input, shape index: {}]   ;;  %s2898_s3 = inlined_call_operand.vmem [shape: f32[1,128], index: 3, kind: input, shape index: {}]   ;;  %s2899_s4 = inlined_call_operand.hbm [shape: bf16[128,128], index: 4, kind: input, shape index: {}]   ;;  %s2900_s5 = inlined_call_operand.vmem [shape: f32[1,128], index: 5, kind: input, shape index: {}]   ;;  %s2901_s6 = inlined_call_operand.hbm [shape: bf16[2,512,128], index: 6, kind: output, shape index: {0}]   ;;  %s2902_s7 = inlined_call_operand.hbm [shape: bf16[2,512,128], index: 7, kind: output, shape index: {1}]  }
   0x1   :  { %2913 = sst [smem:[#allocation26_spill]] %s2895_s0 }
   0x2   :  { %2914 = sst [smem:[#allocation27_spill]] %s2897_s2 }
   0x3   :  { %2915 = sst [smem:[#allocation28_spill]] %s2899_s4 }
   0x4   :  { %2916 = sst [smem:[#allocation29_spill]] %s2901_s6 }
   0x5   :  { %2917 = sst [smem:[#allocation30_spill]] %s2902_s7 }
   0x6   :  { %13 = vsyncpa [#allocation3], 0 }
   0x7   :  { %15 = vsyncpa [#allocation3 + $0x1], 0 }
   0x8   :  { %16 = vsyncpa [#allocation6], 0 }
   0x9   :  { %18 = vsyncpa [#allocation6 + $0x1], 0 }
   0xa   :  { %19 = vsyncpa [#allocation9], 0 }
   0xb   :  { %20 = vsyncpa [#allocation4], 0 }
   0xc   :  { %22 = vsyncpa [#allocation4 + $0x1], 0 }
   0xd   :  { %23 = vsyncpa [#allocation12], 0 }
   0xe   :  { %25 = vsyncpa [#allocation12 + $0x1], 0  ;;  %s2437_s24 = smov 0   ;;  %s2439_s25 = smov 0  }
   0xf   :  { %s2441_s26 = smov 0   ;;  %s2443_s27 = smov 0  }
  0x10   :  { %s2445_s28 = smov 0   ;;  %s2447_s29 = smov 0  }
  0x11   :  { %s2449_s30 = smov 0   ;;  %s2451_s8 = smov 0  }
  0x12 LB: > { %2918 = sst [smem:[#allocation19_spill]] %s2355_s24  ;;  %s2478_s9 = sadd.s32 4294967295, %s2383_s8   ;;  %s2383_s8 = sphi %s2451_s8, %s31_s8   ;;  %s2379_s30 = sphi %s2449_s30, %s2950_s30   ;;  %s2375_s29 = sphi %s2447_s29, %s2956_s29   ;;  %s2371_s28 = sphi %s2445_s28, %s2955_s28   ;;  %s2367_s27 = sphi %s2443_s27, %s2954_s27   ;;  %s2363_s26 = sphi %s2441_s26, %s2953_s26   ;;  %s2359_s25 = sphi %s2439_s25, %s2952_s25   ;;  %s2355_s24 = sphi %s2437_s24, %s2951_s24  }
  0x13   : > { %2919 = sst [smem:[#allocation20_spill]] %s2371_s28  ;;  %s1496_s10 = sadd.s32 4294967294, %s2383_s8  }
  0x14   : > { %2920 = sst [smem:[#allocation21_spill]] %s2379_s30  ;;  %p65_p0 = scmp.ne.s32.totalorder %s2359_s25, %s2355_s24 }
  0x15   : > { %p2903_p1 = scmp.eq.s32.totalorder %s2478_s9, 0  ;;  %p209_p3 = scmp.eq.s32.totalorder %s1496_s10, 3 }
  0x16   : > { %p1497_p5 = scmp.ge.s32.totalorder %s2383_s8, 1  ;;  %p244_p7 = scmp.lt.s32.totalorder %s2383_s8, 5 }
  0x17   : > { %p2487_p4 = por %p2903_p1, %p65_p0  ;;  %p2492_p6 = por %p209_p3, %p65_p0 }
  0x18   : > { %p2497_p8 = pnand %p1497_p5, %p244_p7  ;;  %s2385_s14 = smov [#allocation7]  }
  0x19   : > { %s2922_s12 = scalar_select %p2492_p6, 1, 0 }
  0x1a   : > { %s256_s15 = sshll.u32 %s2385_s14, 4  ;;  %p2022_p9 = pneg %p2497_p8  ;;  %s257_s15 = int_to_ptr.vmem [resolvable:$true] %s256_s15 }
  0x1b   : > { %2923 = sst [smem:[#allocation22_spill]] %s2922_s12  ;;  %s2386_s17 = smov [#allocation8]  }
  0x1c   : > { %p2505_p10 = pnand %p2022_p9, %p2903_p1  ;;  %s272_s18 = sshll.u32 %s2386_s17, 4  ;;  %s273_s18 = int_to_ptr.vmem [resolvable:$true] %s272_s18 }
  0x1d   : > { %s2148_s19 = scalar_lea.vmem %s257_s15, 1024  ;;  %p2156_p3 = scmp.lt.s32.totalorder %s257_s15, %s257_s15 }
  0x1e   : > { %p2139_p11 = pneg %p2505_p10  ;;  %p2149_p12 = scmp.ne.s32.totalorder %s257_s15, %s2148_s19 }
  0x1f   : > { %p2157_p5 = scmp.lt.s32.totalorder %s2148_s19, %s2148_s19 }
  0x20   : > { %p2151_p13 = pnand %p2149_p12, %p2139_p11 }
  0x21   : > { %p2158_p7 = por %p2157_p5, %p2156_p3 }
  0x22   : > { %p2152_p0 = pneg %p2151_p13 }
  0x24   : > { %p2159_p9 = pnand %p2158_p7, %p2152_p0 }
  0x26   : > { %2162 = shalt.err (!%p2159_p9)
}
  0x27   : > { %s2387_s20 = smov 64   ;;  %s2388_s21 = smov 4  }
  0x28   : > { %s2926_s2 = sld [smem:[#allocation27_spill]]  ;;  %s2174_s10 = scalar_lea.vmem %s273_s18, 1024 }
  0x29   : > { %p2175_p1 = scmp.ne.s32.totalorder %s273_s18, %s2174_s10  ;;  %p2182_p2 = scmp.lt.s32.totalorder %s273_s18, %s273_s18 }
  0x2a   : > { %p2183_p6 = scmp.lt.s32.totalorder %s2174_s10, %s2174_s10 }
  0x2b   : > { %p2177_p12 = pnand %p2175_p1, %p2139_p11 }
  0x2c   : > { %p2184_p3 = por %p2183_p6, %p2182_p2 }
  0x2d   : > { %p2178_p13 = pneg %p2177_p12 }
  0x2e   : > { %2025 = dma.hbm_to_vmem [thread:$0]  (!%p2505_p10), %s2926_s2, 1024, %s257_s15, [#allocation6], %s2387_s20, %s2387_s20, %s2388_s21  }
  0x2f   : > { %p2185_p0 = pnand %p2184_p3, %p2178_p13 }
  0x31   : > { %2188 = shalt.err (!%p2185_p0)
}
  0x32   : > { %s2927_s4 = sld [smem:[#allocation28_spill]]  ;;  %s40_s15 = sadd.s32 1, %s2375_s29 }
  0x33   : > { %s43_s19 = sadd.s32 1, %s2379_s30  ;;  %p41_p1 = scmp.ge.s32.totalorder %s40_s15, 2 }
  0x34   : > { %s52_s16 = sadd.s32 1, %s2363_s26  ;;  %p59_p2 = scmp.ne.s32.totalorder %s2363_s26, %s2359_s25 }
  0x35   : > { %p60_p6 = scmp.eq.s32.totalorder %s2383_s8, 0  ;;  %s2958_s15 = smov (%p41_p1, %s40_s15), 0 }
  0x36   : > { %2928 = sst [smem:[#allocation23_spill]] %s2958_s15  ;;  %s2960_s19 = smov (!%p41_p1, %s43_s19), %s2379_s30 }
  0x37   : > { %s48_s22 = ssub.s32 %s2375_s29, %s2958_s15  ;;  %p2538_p11 = por %p60_p6, %p59_p2 }
  0x38   : > { %2028 = dma.hbm_to_vmem [thread:$0]  (!%p2505_p10), %s2927_s4, 1024, %s273_s18, [#allocation9], %s2387_s20, %s2387_s20, %s2388_s21  }
  0x39   : > { %p45_p10 = scmp.ge.s32.totalorder %s2960_s19, 2  ;;  %p2930_p5 = scmp.eq.s32.totalorder %s2478_s9, 3 }
  0x3a   : > { %p2045_p9 = scmp.lt.s32.totalorder %s2383_s8, 4  ;;  %s289_s20 = sand.u32 1, %s2363_s26  }
  0x3b   : > { %p2544_p7 = por %p2930_p5, %p59_p2  ;;  %s2962_s19 = smov (%p45_p10, %s2960_s19), 0 }
  0x3c   : > { %2933 = sst [smem:[#allocation25_spill]] %s2962_s19  ;;  %s2552_s21 = sshll.u32 %s289_s20, 8 }
  0x3d   : > { %s2931_s18 = scalar_select %p2544_p7, 1, 0 }
  0x3e   : > { %s47_s10 = ssub.s32 %s2379_s30, %s2962_s19  ;;  %s1502_s17 = sshll.u32 %s2375_s29, 5 }
  0x3f   : > { %2932 = sst [smem:[#allocation24_spill]] %s2931_s18  ;;  %s49_s14 = sor.u32 %s48_s22, %s47_s10 }
  0x40   : > { %p50_p12 = scmp.eq.s32.totalorder %s49_s14, 0  ;;  %s1503_s2 = sshll.u32 %s2379_s30, 6 }
  0x41   : > { %s2558_s4 = sadd.s32 %s1503_s2, %s1502_s17  ;;  %s293_s15 = scalar_lea.vmem [#allocation2], %s2552_s21 }
  0x42   : > { %s302_s12 = sshll.u32 %s293_s15, 4  ;;  %s1504_s7 = sshll.u32 %s2558_s4, 7  ;;  %s303_s12 = int_to_ptr.vmem [resolvable:$true] %s302_s12 }
  0x43   : > { %s2562_s24 = scalar_select %p50_p12, %s2363_s26, %s52_s16  }
  0x44   : > { %s2934_s0 = sld [smem:[#allocation26_spill]]  ;;  %p2572_p13 = pnand %p2045_p9, %p2538_p11 }
  0x45   : > { %s290_s2 = scalar_lea.sflag [#allocation3], %s289_s20  ;;  %s2202_s15 = scalar_lea.vmem %s303_s12, 4096 }
  0x46   : > { %p2191_p3 = pneg %p2572_p13  ;;  %p2203_p0 = scmp.ne.s32.totalorder %s303_s12, %s2202_s15 }
  0x47   : > { %s2389_s4 = smov [#allocation2]  }
  0x48   : > { %p2205_p1 = pnand %p2203_p0, %p2191_p3  ;;  %s2207_s6 = sshll.u32 %s2389_s4, 4  ;;  %s2208_s6 = int_to_ptr.vmem [resolvable:$false] %s2207_s6 }
  0x49   : > { %s2209_s16 = scalar_lea.vmem %s2208_s6, 8192  ;;  %p2210_p6 = scmp.lt.s32.totalorder %s303_s12, %s2208_s6 }
  0x4a   : > { %s301_s28 = scalar_lea.hbm %s2934_s0, %s1504_s7  ;;  %p2206_p2 = pneg %p2205_p1 }
  0x4b   : > { %p2211_p11 = scmp.lt.s32.totalorder %s2209_s16, %s2202_s15 }
  0x4d   : > { %p2212_p10 = por %p2211_p11, %p2210_p6 }
  0x4f   : > { %p2213_p5 = pnand %p2212_p10, %p2206_p2 }
  0x51   : > { %2216 = shalt.err (!%p2213_p5)
}
  0x52   : > { %s2390_s23 = smov 128   ;;  %s2391_s18 = smov 8  }
  0x53   : > { %2032 = dma.hbm_to_vmem [thread:$0]  (!%p2572_p13), %s301_s28, 4096, %s303_s12, %s290_s2, %s2390_s23, %s2390_s23, %s2391_s18  }
  0x54   : > { %s324_s14 = scalar_lea.hbm %s2896_s1, %s1504_s7  ;;  %s316_s17 = scalar_lea.vmem [#allocation5], %s2552_s21 }
  0x55   : > { %s325_s4 = sshll.u32 %s316_s17, 4  ;;  %s312_s6 = sand.u32 1, %s2383_s8   ;;  %s326_s4 = int_to_ptr.vmem [resolvable:$true] %s325_s4 }
  0x56   : > { %s313_s15 = scalar_lea.sflag [#allocation6], %s312_s6  ;;  %s2230_s16 = scalar_lea.vmem %s326_s4, 4096 }
  0x57   : > { %p2231_p9 = scmp.ne.s32.totalorder %s326_s4, %s2230_s16  ;;  %s2392_s0 = smov [#allocation5]  }
  0x58   : > { %s2235_s19 = sshll.u32 %s2392_s0, 4  ;;  %s2236_s19 = int_to_ptr.vmem [resolvable:$false] %s2235_s19 }
  0x59   : > { %p2233_p12 = pnand %p2231_p9, %p2191_p3  ;;  %s2237_s30 = scalar_lea.vmem %s2236_s19, 8192 }
  0x5a   : > { %p2238_p1 = scmp.lt.s32.totalorder %s326_s4, %s2236_s19  ;;  %p2239_p2 = scmp.lt.s32.totalorder %s2237_s30, %s2230_s16 }
  0x5b   : > { %p2234_p0 = pneg %p2233_p12 }
  0x5c   : > { %p2240_p6 = por %p2239_p2, %p2238_p1 }
  0x5e   : > { %p2241_p11 = pnand %p2240_p6, %p2234_p0 }
  0x60   : > { %2244 = shalt.err (!%p2241_p11)
}
  0x61   : > { %2035 = dma.hbm_to_vmem [thread:$0]  (!%p2572_p13), %s324_s14, 4096, %s326_s4, %s313_s15, %s2390_s23, %s2390_s23, %s2391_s18  }
  0x62   : > { %337 = sbr.rel (%p2497_p8) target bundleno = 442 (0x1ba), region = 44  ;;  %s2596_s7 = sand.u32 (!%p2497_p8), 1, %s2359_s25  }
  0x63   : > { %s1510_s0 = sshll.u32 (!%p2497_p8), %s2596_s7, 8  ;;  %s340_s28 = scalar_lea.sflag (!%p2497_p8), [#allocation3], %s2596_s7 }
  0x64   : > { %s2600_s12 = scalar_lea.vmem (!%p2497_p8), [#allocation2], %s1510_s0 }
  0x67   : > { %2330 = dma.done.wait (%p2487_p4), %s340_s28, 4096  }
  0x68   : > { %2332 = vsyncadd (%p2487_p4), %s340_s28, 4294963200  ;;  %s348_s30 = sand.u32 1, %s2478_s9   ;;  %s2607_s19 = scalar_lea.vmem [#allocation5], %s1510_s0 }
  0x69   : > { %s349_s13 = scalar_lea.sflag [#allocation6], %s348_s30 }
  0x6a   : > { %2334 = dma.done.wait (%p2487_p4), %s349_s13, 4096  }
  0x6b   : > { %2336 = vsyncadd (%p2487_p4), %s349_s13, 4294963200  ;;  %p2936_p8 = scmp.eq.s32.totalorder %s2478_s9, 0 }
  0x6d   : > { %2338 = dma.done.wait (%p2936_p8), [#allocation6], 1024   ;;  %p2937_p13 = pmov %p2936_p8 }
  0x6e   : > { %p2938_p3 = pmov %p2936_p8 }
  0x6f   : > { %2340 = vsyncadd (%p2937_p13), [#allocation6], 4294966272 }
  0x70   : > { %2342 = dma.done.wait (%p2938_p3), [#allocation9], 1024   ;;  %p2939_p10 = pmov %p2938_p3 }
  0x71   : > { %v2121_v0 = vld [vmem:[#allocation7 + $0x38] sm:$0xff]   ;;  %v2123_v2 = vld [vmem:[#allocation7 + $0x30] sm:$0xff]   ;;  %v2125_v4 = vld [vmem:[#allocation7 + $0x28] sm:$0xff]   ;;  %s1514_s2 = sshll.u32 %s2596_s7, 7  ;;  %s2940_s20 = sld [smem:[#allocation20_spill]] }
  0x72   : > { %2344 = vsyncadd (%p2939_p10), [#allocation9], 4294966272  ;;  %v2122_v1 = vld [vmem:[#allocation8 + $0x38] sm:$0xff]   ;;  %1910 = vmatprep.subr.bf16.mxu0 %v2121_v0  ;;  %v2124_v3 = vld [vmem:[#allocation8 + $0x30] sm:$0xff]   ;;  %s2704_s23 = scalar_lea.vmem [#allocation10], %s1514_s2  ;;  %s2707_s18 = scalar_lea.vmem [#allocation11], %s1514_s2 }
  0x73   : > { %1958 = vmatprep.subr.bf16.mxu1 %v2122_v1  ;;  %1911 = vmatpush3.bf16.msra.mxu0 %v2121_v0  ;;  %v2126_v5 = vld [vmem:[#allocation8 + $0x28] sm:$0xff]   ;;  %v2127_v6 = vld [vmem:[#allocation7 + $0x20] sm:$0xff]   ;;  %v2129_v8 = vld [vmem:[#allocation7 + $0x18] sm:$0xff]   ;;  %s1600_s10 = sshll.u32 %s2367_s27, 5  ;;  %s1307_s4 = sshll.u32 %s2704_s23, 4  ;;  %s2804_s4 = int_to_ptr.vmem [resolvable:$true] %s1307_s4 }
  0x74   : > { %1959 = vmatpush3.bf16.msra.mxu1 %v2122_v1  ;;  %1912 = vmatprep.subr.bf16.mxu0 %v2123_v2  ;;  %v2128_v7 = vld [vmem:[#allocation8 + $0x20] sm:$0xff]   ;;  %v2130_v9 = vld [vmem:[#allocation8 + $0x18] sm:$0xff]   ;;  %v2131_v10 = vld [vmem:[#allocation7 + $0x10] sm:$0xff]   ;;  %s2941_s16 = sld [smem:[#allocation29_spill]]  ;;  %s1325_s28 = sshll.u32 %s2707_s18, 4  ;;  %s2813_s28 = int_to_ptr.vmem [resolvable:$true] %s1325_s28 }
  0x75   : > { %1960 = vmatprep.subr.bf16.mxu1 %v2124_v3  ;;  %v406_v11 = vld [vmem:[%s2600_s12] sm:$0xff]  ;;  %v407_v12 = vld [vmem:[%s2600_s12 + $0x8] sm:$0xff]  ;;  %v2132_v14 = vld [vmem:[#allocation8 + $0x10] sm:$0xff]   ;;  %s1287_s11 = scalar_lea.sflag [#allocation4], %s2596_s7  ;;  %s2245_s21 = scalar_lea.vmem %s2804_s4, 2048 }
  0x76   : > { %v454_v13 = vld [vmem:[%s2607_s19] sm:$0xff]  ;;  %v438_v15 = vpack.c.bf16 %v407_v12, %v406_v11  ;;  %v455_v16 = vld [vmem:[%s2607_s19 + $0x8] sm:$0xff]  ;;  %v408_v22 = vld [vmem:[%s2600_s12 + $0x10] sm:$0xff]  ;;  %p2246_p4 = scmp.ne.s32.totalorder %s2804_s4, %s2245_s21  ;;  %s2393_s22 = smov [#allocation10]  }
  0x77   : > { %1913 = vmatpush3.bf16.msra.mxu0 %v2123_v2  ;;  %v486_v17 = vpack.c.bf16 %v455_v16, %v454_v13  ;;  %v2133_v18 = vld [vmem:[#allocation7 + $0x8] sm:$0xff]   ;;  %v2135_v20 = vld [vmem:[#allocation7] sm:$0xff]   ;;  %v409_v23 = vld [vmem:[%s2600_s12 + $0x18] sm:$0xff]  ;;  %s1601_s14 = sshll.u32 %s2940_s20, 6  ;;  %s2249_s2 = sshll.u32 %s2393_s22, 4  ;;  %s2250_s2 = int_to_ptr.vmem [resolvable:$false] %s2249_s2 }
  0x78   : > { %1961 = vmatpush3.bf16.msra.mxu1 %v2124_v3  ;;  %1914 = vmatprep.subr.bf16.mxu0 %v2125_v4  ;;  %v2134_v19 = vld [vmem:[#allocation8 + $0x8] sm:$0xff]   ;;  %v2136_v21 = vld [vmem:[#allocation8] sm:$0xff]   ;;  %v456_v24 = vld [vmem:[%s2607_s19 + $0x10] sm:$0xff]  ;;  %v439_v30 = vpack.c.bf16 %v409_v23, %v408_v22  ;;  %s2783_s27 = sadd.s32 %s1601_s14, %s1600_s10  ;;  %p2247_p5 = pnand %p2246_p4, %p2544_p7 }
  0x79   : > { %1962 = vmatprep.subr.bf16.mxu1 %v2126_v5  ;;  %1926 = vmatprep.mubr.bf16.mxu0 %v438_v15  ;;  %v457_v25 = vld [vmem:[%s2607_s19 + $0x18] sm:$0xff]  ;;  %v410_v26 = vld [vmem:[%s2600_s12 + $0x20] sm:$0xff]  ;;  %v411_v27 = vld [vmem:[%s2600_s12 + $0x28] sm:$0xff]  ;;  %s1602_s17 = sshll.u32 %s2783_s27, 6  ;;  %s2251_s20 = scalar_lea.vmem %s2250_s2, 4096 }
  0x7a   : > { %1974 = vmatprep.mubr.bf16.mxu1 %v486_v17  ;;  %v458_v28 = vld [vmem:[%s2607_s19 + $0x20] sm:$0xff]  ;;  %v459_v29 = vld [vmem:[%s2607_s19 + $0x28] sm:$0xff]  ;;  %v487_v31 = vpack.c.bf16 %v457_v25, %v456_v24  ;;  %v440_v32 = vpack.c.bf16 %v411_v27, %v410_v26  ;;  %v412_v34 = vld [vmem:[%s2600_s12 + $0x30] sm:$0xff]  ;;  %s2799_s0 = scalar_lea.hbm %s2941_s16, %s1602_s17  ;;  %p2248_p9 = pneg %p2247_p5 }
  0x7b   : > { %1915 = vmatpush3.bf16.msra.mxu0 %v2125_v4  ;;  %v488_v33 = vpack.c.bf16 %v459_v29, %v458_v28  ;;  %v413_v35 = vld [vmem:[%s2600_s12 + $0x38] sm:$0xff]  ;;  %v460_v36 = vld [vmem:[%s2607_s19 + $0x30] sm:$0xff]  ;;  %v414_v38 = vld [vmem:[%s2600_s12 + $0x40] sm:$0xff]  ;;  %p2252_p12 = scmp.lt.s32.totalorder %s2804_s4, %s2250_s2  ;;  %p2253_p0 = scmp.lt.s32.totalorder %s2251_s20, %s2245_s21 }
  0x7c   : > { %1963 = vmatpush3.bf16.msra.mxu1 %v2126_v5  ;;  %1916 = vmatprep.subr.bf16.mxu0 %v2127_v6  ;;  %v461_v37 = vld [vmem:[%s2607_s19 + $0x38] sm:$0xff]  ;;  %v415_v39 = vld [vmem:[%s2600_s12 + $0x48] sm:$0xff]  ;;  %v462_v40 = vld [vmem:[%s2607_s19 + $0x40] sm:$0xff]  ;;  %v441_v42 = vpack.c.bf16 %v413_v35, %v412_v34 }
  0x7d   : > { %1964 = vmatprep.subr.bf16.mxu1 %v2128_v7  ;;  %v463_v41 = vld [vmem:[%s2607_s19 + $0x48] sm:$0xff]  ;;  %v489_v43 = vpack.c.bf16 %v461_v37, %v460_v36  ;;  %v442_v44 = vpack.c.bf16 %v415_v39, %v414_v38  ;;  %v416_v46 = vld [vmem:[%s2600_s12 + $0x50] sm:$0xff]  ;;  %v417_v47 = vld [vmem:[%s2600_s12 + $0x58] sm:$0xff]  ;;  %p2254_p1 = por %p2253_p0, %p2252_p12 }
  0x7e   : > { %v490_v45 = vpack.c.bf16 %v463_v41, %v462_v40  ;;  %v464_v48 = vld [vmem:[%s2607_s19 + $0x50] sm:$0xff]  ;;  %v465_v49 = vld [vmem:[%s2607_s19 + $0x58] sm:$0xff]  ;;  %v418_v50 = vld [vmem:[%s2600_s12 + $0x60] sm:$0xff]  ;;  %v443_v54 = vpack.c.bf16 %v417_v47, %v416_v46 }
  0x7f   : > { %1917 = vmatpush3.bf16.msra.mxu0 %v2127_v6  ;;  %v419_v51 = vld [vmem:[%s2600_s12 + $0x68] sm:$0xff]  ;;  %v466_v52 = vld [vmem:[%s2607_s19 + $0x60] sm:$0xff]  ;;  %v491_v55 = vpack.c.bf16 %v465_v49, %v464_v48  ;;  %v420_v58 = vld [vmem:[%s2600_s12 + $0x70] sm:$0xff]  ;;  %p2255_p2 = pnand %p2254_p1, %p2248_p9 }
  0x80   : > { %1965 = vmatpush3.bf16.msra.mxu1 %v2128_v7  ;;  %1918 = vmatprep.subr.bf16.mxu0 %v2129_v8  ;;  %v467_v53 = vld [vmem:[%s2607_s19 + $0x68] sm:$0xff]  ;;  %v444_v56 = vpack.c.bf16 %v419_v51, %v418_v50  ;;  %v421_v59 = vld [vmem:[%s2600_s12 + $0x78] sm:$0xff]  ;;  %v468_v60 = vld [vmem:[%s2607_s19 + $0x70] sm:$0xff] }
  0x81   : > { %1966 = vmatprep.subr.bf16.mxu1 %v2130_v9  ;;  %v492_v57 = vpack.c.bf16 %v467_v53, %v466_v52  ;;  %v469_v61 = vld [vmem:[%s2607_s19 + $0x78] sm:$0xff]  ;;  %v422_v62 = vld [vmem:[%s2600_s12 + $0x80] sm:$0xff]  ;;  %v423_v63 = vld [vmem:[%s2600_s12 + $0x88] sm:$0xff]  ;;  %v445_v2 = vpack.c.bf16 %v421_v59, %v420_v58 }
  0x82   : > { %v470_v0 = vld [vmem:[%s2607_s19 + $0x80] sm:$0xff]  ;;  %v471_v1 = vld [vmem:[%s2607_s19 + $0x88] sm:$0xff]  ;;  %v493_v3 = vpack.c.bf16 %v469_v61, %v468_v60  ;;  %v446_v4 = vpack.c.bf16 %v423_v63, %v422_v62  ;;  %v424_v6 = vld [vmem:[%s2600_s12 + $0x90] sm:$0xff] }
  0x83   : > { %1919 = vmatpush3.bf16.msra.mxu0 %v2129_v8  ;;  %v494_v5 = vpack.c.bf16 %v471_v1, %v470_v0  ;;  %v425_v7 = vld [vmem:[%s2600_s12 + $0x98] sm:$0xff]  ;;  %v472_v8 = vld [vmem:[%s2607_s19 + $0x90] sm:$0xff]  ;;  %v427_v11 = vld [vmem:[%s2600_s12 + $0xa8] sm:$0xff] }
  0x84   : > { %1967 = vmatpush3.bf16.msra.mxu1 %v2130_v9  ;;  %1920 = vmatprep.subr.bf16.mxu0 %v2131_v10  ;;  %v473_v9 = vld [vmem:[%s2607_s19 + $0x98] sm:$0xff]  ;;  %v474_v12 = vld [vmem:[%s2607_s19 + $0xa0] sm:$0xff]  ;;  %v475_v13 = vld [vmem:[%s2607_s19 + $0xa8] sm:$0xff] }
  0x85   : > { %1968 = vmatprep.subr.bf16.mxu1 %v2132_v14  ;;  %v495_v15 = vpack.c.bf16 %v473_v9, %v472_v8  ;;  %v496_v17 = vpack.c.bf16 %v475_v13, %v474_v12  ;;  %v430_v22 = vld [vmem:[%s2600_s12 + $0xc0] sm:$0xff]  ;;  %v431_v23 = vld [vmem:[%s2600_s12 + $0xc8] sm:$0xff] }
  0x86   : > { %v478_v24 = vld [vmem:[%s2607_s19 + $0xc0] sm:$0xff]  ;;  %v479_v25 = vld [vmem:[%s2607_s19 + $0xc8] sm:$0xff]  ;;  %v450_v28 = vpack.c.bf16 %v431_v23, %v430_v22 }
  0x87   : > { %1921 = vmatpush3.bf16.msra.mxu0 %v2131_v10  ;;  %v426_v10 = vld [vmem:[%s2600_s12 + $0xa0] sm:$0xff]  ;;  %v498_v29 = vpack.c.bf16 %v479_v25, %v478_v24  ;;  %v435_v35 = vld [vmem:[%s2600_s12 + $0xe8] sm:$0xff] }
  0x88   : > { %1969 = vmatpush3.bf16.msra.mxu1 %v2132_v14  ;;  %1922 = vmatprep.subr.bf16.mxu0 %v2133_v18  ;;  %v447_v14 = vpack.c.bf16 %v425_v7, %v424_v6  ;;  %v448_v16 = vpack.c.bf16 %v427_v11, %v426_v10  ;;  %v434_v34 = vld [vmem:[%s2600_s12 + $0xe0] sm:$0xff]  ;;  %v483_v37 = vld [vmem:[%s2607_s19 + $0xe8] sm:$0xff] }
  0x89   : > { %1970 = vmatprep.subr.bf16.mxu1 %v2134_v19  ;;  %v482_v36 = vld [vmem:[%s2607_s19 + $0xe0] sm:$0xff]  ;;  %v452_v40 = vpack.c.bf16 %v435_v35, %v434_v34 }
  0x8a   : > { %v500_v41 = vpack.c.bf16 %v483_v37, %v482_v36  ;;  %v2688_v50 = vld [vmem:[%s2898_s3] ss:$0 sm:$0xff] }
  0x8b   : > { %1923 = vmatpush3.bf16.msra.mxu0 %v2133_v18  ;;  %v428_v18 = vld [vmem:[%s2600_s12 + $0xb0] sm:$0xff]  ;;  %v2693_v52 = vld [vmem:[%s2900_s5] ss:$0 sm:$0xff] }
  0x8c   : > { %1971 = vmatpush3.bf16.msra.mxu1 %v2134_v19  ;;  %1924 = vmatprep.subr.bf16.mxu0 %v2135_v20  ;;  %v429_v19 = vld [vmem:[%s2600_s12 + $0xb8] sm:$0xff] }
  0x8d   : > { %1972 = vmatprep.subr.bf16.mxu1 %v2136_v21  ;;  %v449_v26 = vpack.c.bf16 %v429_v19, %v428_v18 }
  0x8f   : > { %1925 = vmatpush3.bf16.msra.mxu0 %v2135_v20  ;;  %v476_v20 = vld [vmem:[%s2607_s19 + $0xb0] sm:$0xff] }
  0x90   : > { %1973 = vmatpush3.bf16.msra.mxu1 %v2136_v21  ;;  %v477_v21 = vld [vmem:[%s2607_s19 + $0xb8] sm:$0xff] }
  0x91   : > { %v497_v27 = vpack.c.bf16 %v477_v21, %v476_v20 }
  0x92   : > { %1927 = vmatmul.mubr.bf16.vlgmr.msra.gmra.mxu0 %v439_v30  ;;  %v432_v30 = vld [vmem:[%s2600_s12 + $0xd0] sm:$0xff] }
  0x93   : > { %1975 = vmatmul.mubr.bf16.vlgmr.msra.gmra.mxu1 %v487_v31  ;;  %1930 = vmatprep.mubr.bf16.mxu0 %v440_v32  ;;  %v433_v31 = vld [vmem:[%s2600_s12 + $0xd8] sm:$0xff]  ;;  %v480_v32 = vld [vmem:[%s2607_s19 + $0xd0] sm:$0xff] }
  0x94   : > { %1978 = vmatprep.mubr.bf16.mxu1 %v488_v33  ;;  %v481_v33 = vld [vmem:[%s2607_s19 + $0xd8] sm:$0xff]  ;;  %v451_v38 = vpack.c.bf16 %v433_v31, %v432_v30 }
  0x95   : > { %v499_v39 = vpack.c.bf16 %v481_v33, %v480_v32 }
  0x9a   : > { %1931 = vmatmul.mubr.bf16.gmra.mxu0 %v441_v42  ;;  %v436_v42 = vld [vmem:[%s2600_s12 + $0xf0] sm:$0xff] }
  0x9b   : > { %1979 = vmatmul.mubr.bf16.gmra.mxu1 %v489_v43  ;;  %1934 = vmatprep.mubr.bf16.mxu0 %v442_v44  ;;  %v437_v43 = vld [vmem:[%s2600_s12 + $0xf8] sm:$0xff]  ;;  %v484_v44 = vld [vmem:[%s2607_s19 + $0xf0] sm:$0xff] }
  0x9c   : > { %1982 = vmatprep.mubr.bf16.mxu1 %v490_v45  ;;  %v485_v45 = vld [vmem:[%s2607_s19 + $0xf8] sm:$0xff]  ;;  %v453_v46 = vpack.c.bf16 %v437_v43, %v436_v42  ;;  %s2943_s19 = sld [smem:[#allocation30_spill]] }
  0x9d   : > { %v501_v47 = vpack.c.bf16 %v485_v45, %v484_v44 }
  0xa2   : > { %1935 = vmatmul.mubr.bf16.gmra.mxu0 %v443_v54  ;;  %s2811_s9 = scalar_lea.hbm %s2943_s19, %s1602_s17 }
  0xa3   : > { %1983 = vmatmul.mubr.bf16.gmra.mxu1 %v491_v55  ;;  %1938 = vmatprep.mubr.bf16.mxu0 %v444_v56 }
  0xa4   : > { %1986 = vmatprep.mubr.bf16.mxu1 %v492_v57 }
  0xaa   : > { %1939 = vmatmul.mubr.bf16.gmra.mxu0 %v445_v2 }
  0xab   : > { %1987 = vmatmul.mubr.bf16.gmra.mxu1 %v493_v3  ;;  %1942 = vmatprep.mubr.bf16.mxu0 %v446_v4 }
  0xac   : > { %1990 = vmatprep.mubr.bf16.mxu1 %v494_v5 }
  0xb2   : > { %1943 = vmatmul.mubr.bf16.gmra.mxu0 %v447_v14 }
  0xb3   : > { %1991 = vmatmul.mubr.bf16.gmra.mxu1 %v495_v15  ;;  %1946 = vmatprep.mubr.bf16.mxu0 %v448_v16 }
  0xb4   : > { %1994 = vmatprep.mubr.bf16.mxu1 %v496_v17 }
  0xba   : > { %1947 = vmatmul.mubr.bf16.gmra.mxu0 %v449_v26 }
  0xbb   : > { %1995 = vmatmul.mubr.bf16.gmra.mxu1 %v497_v27  ;;  %1950 = vmatprep.mubr.bf16.mxu0 %v450_v28 }
  0xbc   : > { %1998 = vmatprep.mubr.bf16.mxu1 %v498_v29 }
  0xc2   : > { %1951 = vmatmul.mubr.bf16.gmra.mxu0 %v451_v38 }
  0xc3   : > { %1999 = vmatmul.mubr.bf16.gmra.mxu1 %v499_v39  ;;  %1954 = vmatprep.mubr.bf16.mxu0 %v452_v40 }
  0xc4   : > { %2002 = vmatprep.mubr.bf16.mxu1 %v500_v41 }
  0xca   : > { %1955 = vmatmul.mubr.bf16.gmra.mxu0 %v453_v46 }
  0xcb   : > { %2003 = vmatmul.mubr.bf16.gmra.mxu1 %v501_v47 }
 0x152   : > { %v1928_v48 = vpop.f32.mrf.mxu0 }
 0x153   : > { %v1976_v49 = vpop.f32.mrf.mxu1  ;;  %v616_v55 = vadd.f32 %v1928_v48, %v2688_v50 }
 0x154   : > { %v607_v51 = vpop.f32.mrf.mxu0  ;;  %v848_v58 = vadd.f32 %v1976_v49, %v2693_v52 }
 0x155   : > { %v839_v53 = vpop.f32.mrf.mxu1  ;;  %v608_v61 = vadd.f32 %v2688_v50, %v607_v51 }
 0x156   : > { %v1929_v54 = vpop.f32.mrf.mxu0  ;;  %v840_v1 = vadd.f32 %v2693_v52, %v839_v53 }
 0x157   : > { %v619_v56 = vadd.f32 %v1929_v54, %v2688_v50  ;;  %v1977_v57 = vpop.f32.mrf.mxu1 }
 0x158   : > { %v851_v59 = vadd.f32 %v1977_v57, %v2693_v52  ;;  %v610_v60 = vpop.f32.mrf.mxu0 }
 0x159   : > { %v1680_v62 = vpack.c.bf16 %v619_v56, %v616_v55  ;;  %v611_v63 = vadd.f32 %v2688_v50, %v610_v60  ;;  %v842_v0 = vpop.f32.mrf.mxu1 }
 0x15a   : > { %v1760_v2 = vpack.c.bf16 %v851_v59, %v848_v58  ;;  %v843_v3 = vadd.f32 %v2693_v52, %v842_v0  ;;  %v1932_v4 = vpop.f32.mrf.mxu0 }
 0x15b   : > { %1832 = vst [vmem:[%s2704_s23 + $0x8] sm:$0xff] %v1680_v62   ;;  %v1675_v5 = vpack.c.bf16 %v611_v63, %v608_v61  ;;  %v1980_v6 = vpop.f32.mrf.mxu1  ;;  %v632_v11 = vadd.f32 %v1932_v4, %v2688_v50 }
 0x15c   : > { %1847 = vst [vmem:[%s2707_s18 + $0x8] sm:$0xff] %v1760_v2   ;;  %v1755_v7 = vpack.c.bf16 %v843_v3, %v840_v1  ;;  %v623_v8 = vpop.f32.mrf.mxu0  ;;  %v864_v14 = vadd.f32 %v1980_v6, %v2693_v52 }
 0x15d   : > { %1676 = vst [vmem:[%s2704_s23] sm:$0xff] %v1675_v5   ;;  %v855_v9 = vpop.f32.mrf.mxu1  ;;  %v624_v17 = vadd.f32 %v2688_v50, %v623_v8 }
 0x15e   : > { %1756 = vst [vmem:[%s2707_s18] sm:$0xff] %v1755_v7   ;;  %v1933_v10 = vpop.f32.mrf.mxu0  ;;  %v856_v21 = vadd.f32 %v2693_v52, %v855_v9 }
 0x15f   : > { %v635_v12 = vadd.f32 %v1933_v10, %v2688_v50  ;;  %v1981_v13 = vpop.f32.mrf.mxu1 }
 0x160   : > { %v867_v15 = vadd.f32 %v1981_v13, %v2693_v52  ;;  %v626_v16 = vpop.f32.mrf.mxu0 }
 0x161   : > { %v1690_v18 = vpack.c.bf16 %v635_v12, %v632_v11  ;;  %v627_v19 = vadd.f32 %v2688_v50, %v626_v16  ;;  %v858_v20 = vpop.f32.mrf.mxu1 }
 0x162   : > { %v1770_v22 = vpack.c.bf16 %v867_v15, %v864_v14  ;;  %v859_v23 = vadd.f32 %v2693_v52, %v858_v20  ;;  %v1936_v24 = vpop.f32.mrf.mxu0 }
 0x163   : > { %1834 = vst [vmem:[%s2704_s23 + $0x18] sm:$0xff] %v1690_v18   ;;  %v1685_v25 = vpack.c.bf16 %v627_v19, %v624_v17  ;;  %v1984_v26 = vpop.f32.mrf.mxu1  ;;  %v648_v31 = vadd.f32 %v1936_v24, %v2688_v50 }
 0x164   : > { %1849 = vst [vmem:[%s2707_s18 + $0x18] sm:$0xff] %v1770_v22   ;;  %v1765_v27 = vpack.c.bf16 %v859_v23, %v856_v21  ;;  %v639_v28 = vpop.f32.mrf.mxu0  ;;  %v880_v34 = vadd.f32 %v1984_v26, %v2693_v52 }
 0x165   : > { %1833 = vst [vmem:[%s2704_s23 + $0x10] sm:$0xff] %v1685_v25   ;;  %v871_v29 = vpop.f32.mrf.mxu1  ;;  %v640_v37 = vadd.f32 %v2688_v50, %v639_v28 }
 0x166   : > { %1848 = vst [vmem:[%s2707_s18 + $0x10] sm:$0xff] %v1765_v27   ;;  %v1937_v30 = vpop.f32.mrf.mxu0  ;;  %v872_v41 = vadd.f32 %v2693_v52, %v871_v29 }
 0x167   : > { %v651_v32 = vadd.f32 %v1937_v30, %v2688_v50  ;;  %v1985_v33 = vpop.f32.mrf.mxu1 }
 0x168   : > { %v883_v35 = vadd.f32 %v1985_v33, %v2693_v52  ;;  %v642_v36 = vpop.f32.mrf.mxu0 }
 0x169   : > { %v1700_v38 = vpack.c.bf16 %v651_v32, %v648_v31  ;;  %v643_v39 = vadd.f32 %v2688_v50, %v642_v36  ;;  %v874_v40 = vpop.f32.mrf.mxu1 }
 0x16a   : > { %v1780_v42 = vpack.c.bf16 %v883_v35, %v880_v34  ;;  %v875_v43 = vadd.f32 %v2693_v52, %v874_v40  ;;  %v1940_v44 = vpop.f32.mrf.mxu0 }
 0x16b   : > { %1836 = vst [vmem:[%s2704_s23 + $0x28] sm:$0xff] %v1700_v38   ;;  %v1695_v45 = vpack.c.bf16 %v643_v39, %v640_v37  ;;  %v1988_v46 = vpop.f32.mrf.mxu1  ;;  %v664_v53 = vadd.f32 %v1940_v44, %v2688_v50 }
 0x16c   : > { %1851 = vst [vmem:[%s2707_s18 + $0x28] sm:$0xff] %v1780_v42   ;;  %v1775_v47 = vpack.c.bf16 %v875_v43, %v872_v41  ;;  %v655_v48 = vpop.f32.mrf.mxu0  ;;  %v896_v56 = vadd.f32 %v1988_v46, %v2693_v52 }
 0x16d   : > { %1835 = vst [vmem:[%s2704_s23 + $0x20] sm:$0xff] %v1695_v45   ;;  %v887_v49 = vpop.f32.mrf.mxu1  ;;  %v656_v59 = vadd.f32 %v2688_v50, %v655_v48 }
 0x16e   : > { %1850 = vst [vmem:[%s2707_s18 + $0x20] sm:$0xff] %v1775_v47   ;;  %v1941_v51 = vpop.f32.mrf.mxu0  ;;  %v888_v63 = vadd.f32 %v2693_v52, %v887_v49 }
 0x16f   : > { %v667_v54 = vadd.f32 %v1941_v51, %v2688_v50  ;;  %v1989_v55 = vpop.f32.mrf.mxu1 }
 0x170   : > { %v899_v57 = vadd.f32 %v1989_v55, %v2693_v52  ;;  %v658_v58 = vpop.f32.mrf.mxu0 }
 0x171   : > { %v1710_v60 = vpack.c.bf16 %v667_v54, %v664_v53  ;;  %v659_v61 = vadd.f32 %v2688_v50, %v658_v58  ;;  %v890_v62 = vpop.f32.mrf.mxu1 }
 0x172   : > { %v1790_v0 = vpack.c.bf16 %v899_v57, %v896_v56  ;;  %v891_v1 = vadd.f32 %v2693_v52, %v890_v62  ;;  %v1944_v2 = vpop.f32.mrf.mxu0 }
 0x173   : > { %1838 = vst [vmem:[%s2704_s23 + $0x38] sm:$0xff] %v1710_v60   ;;  %v1705_v3 = vpack.c.bf16 %v659_v61, %v656_v59  ;;  %v1992_v4 = vpop.f32.mrf.mxu1  ;;  %v680_v9 = vadd.f32 %v1944_v2, %v2688_v50 }
 0x174   : > { %1853 = vst [vmem:[%s2707_s18 + $0x38] sm:$0xff] %v1790_v0   ;;  %v1785_v5 = vpack.c.bf16 %v891_v1, %v888_v63  ;;  %v671_v6 = vpop.f32.mrf.mxu0  ;;  %v912_v12 = vadd.f32 %v1992_v4, %v2693_v52 }
 0x175   : > { %1837 = vst [vmem:[%s2704_s23 + $0x30] sm:$0xff] %v1705_v3   ;;  %v903_v7 = vpop.f32.mrf.mxu1  ;;  %v672_v15 = vadd.f32 %v2688_v50, %v671_v6 }
 0x176   : > { %1852 = vst [vmem:[%s2707_s18 + $0x30] sm:$0xff] %v1785_v5   ;;  %v1945_v8 = vpop.f32.mrf.mxu0  ;;  %v904_v19 = vadd.f32 %v2693_v52, %v903_v7 }
 0x177   : > { %v683_v10 = vadd.f32 %v1945_v8, %v2688_v50  ;;  %v1993_v11 = vpop.f32.mrf.mxu1 }
 0x178   : > { %v915_v13 = vadd.f32 %v1993_v11, %v2693_v52  ;;  %v674_v14 = vpop.f32.mrf.mxu0 }
 0x179   : > { %v1720_v16 = vpack.c.bf16 %v683_v10, %v680_v9  ;;  %v675_v17 = vadd.f32 %v2688_v50, %v674_v14  ;;  %v906_v18 = vpop.f32.mrf.mxu1 }
 0x17a   : > { %v1800_v20 = vpack.c.bf16 %v915_v13, %v912_v12  ;;  %v907_v21 = vadd.f32 %v2693_v52, %v906_v18  ;;  %v1948_v22 = vpop.f32.mrf.mxu0 }
 0x17b   : > { %1840 = vst [vmem:[%s2704_s23 + $0x48] sm:$0xff] %v1720_v16   ;;  %v1715_v23 = vpack.c.bf16 %v675_v17, %v672_v15  ;;  %v1996_v24 = vpop.f32.mrf.mxu1  ;;  %v696_v29 = vadd.f32 %v1948_v22, %v2688_v50 }
 0x17c   : > { %1855 = vst [vmem:[%s2707_s18 + $0x48] sm:$0xff] %v1800_v20   ;;  %v1795_v25 = vpack.c.bf16 %v907_v21, %v904_v19  ;;  %v687_v26 = vpop.f32.mrf.mxu0  ;;  %v928_v32 = vadd.f32 %v1996_v24, %v2693_v52 }
 0x17d   : > { %1839 = vst [vmem:[%s2704_s23 + $0x40] sm:$0xff] %v1715_v23   ;;  %v919_v27 = vpop.f32.mrf.mxu1  ;;  %v688_v35 = vadd.f32 %v2688_v50, %v687_v26 }
 0x17e   : > { %1854 = vst [vmem:[%s2707_s18 + $0x40] sm:$0xff] %v1795_v25   ;;  %v1949_v28 = vpop.f32.mrf.mxu0  ;;  %v920_v39 = vadd.f32 %v2693_v52, %v919_v27 }
 0x17f   : > { %v699_v30 = vadd.f32 %v1949_v28, %v2688_v50  ;;  %v1997_v31 = vpop.f32.mrf.mxu1 }
 0x180   : > { %v931_v33 = vadd.f32 %v1997_v31, %v2693_v52  ;;  %v690_v34 = vpop.f32.mrf.mxu0 }
 0x181   : > { %v1730_v36 = vpack.c.bf16 %v699_v30, %v696_v29  ;;  %v691_v37 = vadd.f32 %v2688_v50, %v690_v34  ;;  %v922_v38 = vpop.f32.mrf.mxu1 }
 0x182   : > { %v1810_v40 = vpack.c.bf16 %v931_v33, %v928_v32  ;;  %v923_v41 = vadd.f32 %v2693_v52, %v922_v38  ;;  %v1952_v42 = vpop.f32.mrf.mxu0 }
 0x183   : > { %1842 = vst [vmem:[%s2704_s23 + $0x58] sm:$0xff] %v1730_v36   ;;  %v1725_v43 = vpack.c.bf16 %v691_v37, %v688_v35  ;;  %v2000_v44 = vpop.f32.mrf.mxu1  ;;  %v712_v49 = vadd.f32 %v1952_v42, %v2688_v50 }
 0x184   : > { %1857 = vst [vmem:[%s2707_s18 + $0x58] sm:$0xff] %v1810_v40   ;;  %v1805_v45 = vpack.c.bf16 %v923_v41, %v920_v39  ;;  %v703_v46 = vpop.f32.mrf.mxu0  ;;  %v944_v54 = vadd.f32 %v2000_v44, %v2693_v52 }
 0x185   : > { %1841 = vst [vmem:[%s2704_s23 + $0x50] sm:$0xff] %v1725_v43   ;;  %v935_v47 = vpop.f32.mrf.mxu1  ;;  %v704_v57 = vadd.f32 %v2688_v50, %v703_v46 }
 0x186   : > { %1856 = vst [vmem:[%s2707_s18 + $0x50] sm:$0xff] %v1805_v45   ;;  %v1953_v48 = vpop.f32.mrf.mxu0  ;;  %v936_v61 = vadd.f32 %v2693_v52, %v935_v47 }
 0x187   : > { %v715_v51 = vadd.f32 %v1953_v48, %v2688_v50  ;;  %v2001_v53 = vpop.f32.mrf.mxu1 }
 0x188   : > { %v947_v55 = vadd.f32 %v2001_v53, %v2693_v52  ;;  %v706_v56 = vpop.f32.mrf.mxu0 }
 0x189   : > { %v1740_v58 = vpack.c.bf16 %v715_v51, %v712_v49  ;;  %v707_v59 = vadd.f32 %v2688_v50, %v706_v56  ;;  %v938_v60 = vpop.f32.mrf.mxu1 }
 0x18a   : > { %v1820_v62 = vpack.c.bf16 %v947_v55, %v944_v54  ;;  %v939_v63 = vadd.f32 %v2693_v52, %v938_v60  ;;  %v1956_v0 = vpop.f32.mrf.mxu0 }
 0x18b   : > { %1844 = vst [vmem:[%s2704_s23 + $0x68] sm:$0xff] %v1740_v58   ;;  %v1735_v1 = vpack.c.bf16 %v707_v59, %v704_v57  ;;  %v2004_v2 = vpop.f32.mrf.mxu1  ;;  %v728_v7 = vadd.f32 %v1956_v0, %v2688_v50 }
 0x18c   : > { %1859 = vst [vmem:[%s2707_s18 + $0x68] sm:$0xff] %v1820_v62   ;;  %v1815_v3 = vpack.c.bf16 %v939_v63, %v936_v61  ;;  %v719_v4 = vpop.f32.mrf.mxu0  ;;  %v960_v10 = vadd.f32 %v2004_v2, %v2693_v52 }
 0x18d   : > { %1843 = vst [vmem:[%s2704_s23 + $0x60] sm:$0xff] %v1735_v1   ;;  %v951_v5 = vpop.f32.mrf.mxu1  ;;  %v720_v13 = vadd.f32 %v2688_v50, %v719_v4 }
 0x18e   : > { %1858 = vst [vmem:[%s2707_s18 + $0x60] sm:$0xff] %v1815_v3   ;;  %v1957_v6 = vpop.f32.mrf.mxu0  ;;  %v952_v17 = vadd.f32 %v2693_v52, %v951_v5 }
 0x18f   : > { %v731_v8 = vadd.f32 %v1957_v6, %v2688_v50  ;;  %v2005_v9 = vpop.f32.mrf.mxu1 }
 0x190   : > { %v963_v11 = vadd.f32 %v2005_v9, %v2693_v52  ;;  %v722_v12 = vpop.f32.mrf.mxu0 }
 0x191   : > { %v1750_v14 = vpack.c.bf16 %v731_v8, %v728_v7  ;;  %v723_v15 = vadd.f32 %v2688_v50, %v722_v12  ;;  %v954_v16 = vpop.f32.mrf.mxu1 }
 0x192   : > { %v1830_v18 = vpack.c.bf16 %v963_v11, %v960_v10  ;;  %v955_v19 = vadd.f32 %v2693_v52, %v954_v16 }
 0x193   : > { %1846 = vst [vmem:[%s2704_s23 + $0x78] sm:$0xff] %v1750_v14   ;;  %v1745_v50 = vpack.c.bf16 %v723_v15, %v720_v13 }
 0x194   : > { %1861 = vst [vmem:[%s2707_s18 + $0x78] sm:$0xff] %v1830_v18   ;;  %v1825_v20 = vpack.c.bf16 %v955_v19, %v952_v17 }
 0x195   : > { %1845 = vst [vmem:[%s2704_s23 + $0x70] sm:$0xff] %v1745_v50  }
 0x196   : > { %1860 = vst [vmem:[%s2707_s18 + $0x70] sm:$0xff] %v1825_v20  }
 0x197   : > { %2258 = shalt.err (!%p2255_p2)
}
 0x198   : > { %s2259_s23 = scalar_lea.hbm %s2799_s0, 2048  ;;  %s2263_s14 = scalar_lea.hbm %s2941_s16, 8192 }
 0x199   : > { %p2260_p6 = scmp.ne.s32.totalorder %s2799_s0, %s2259_s23  ;;  %p2264_p13 = scmp.lt.s32.totalorder %s2799_s0, %s2941_s16 }
 0x19a   : > { %p2265_p3 = scmp.lt.s32.totalorder %s2263_s14, %s2259_s23 }
 0x19b   : > { %p2261_p11 = pnand %p2260_p6, %p2544_p7 }
 0x19c   : > { %p2266_p10 = por %p2265_p3, %p2264_p13 }
 0x19d   : > { %p2262_p8 = pneg %p2261_p11 }
 0x19f   : > { %p2267_p4 = pnand %p2266_p10, %p2262_p8 }
 0x1a1   : > { %2270 = shalt.err (!%p2267_p4)
}
 0x1a2   : > { %s2394_s6 = smov 64   ;;  %s2395_s15 = smov 4  }
 0x1a3   : > { %2018 = dma.vmem_to_hbm [thread:$0]  (%p2544_p7), %s2804_s4, 2048, %s2799_s0, %s1287_s11, %s2394_s6, %s2394_s6, %s2395_s15  }
 0x1a4   : > { %s1292_s30 = scalar_lea.sflag [#allocation12], %s2596_s7  ;;  %s2271_s13 = scalar_lea.vmem %s2813_s28, 2048 }
 0x1a5   : > { %p2272_p5 = scmp.ne.s32.totalorder %s2813_s28, %s2271_s13  ;;  %s2396_s21 = smov [#allocation11]  }
 0x1a6   : > { %s2275_s22 = sshll.u32 %s2396_s21, 4  ;;  %s2276_s22 = int_to_ptr.vmem [resolvable:$false] %s2275_s22 }
 0x1a7   : > { %p2273_p9 = pnand %p2272_p5, %p2544_p7  ;;  %s2277_s2 = scalar_lea.vmem %s2276_s22, 4096 }
 0x1a8   : > { %p2278_p0 = scmp.lt.s32.totalorder %s2813_s28, %s2276_s22  ;;  %p2279_p1 = scmp.lt.s32.totalorder %s2277_s2, %s2271_s13 }
 0x1a9   : > { %p2274_p12 = pneg %p2273_p9 }
 0x1aa   : > { %p2280_p2 = por %p2279_p1, %p2278_p0 }
 0x1ac   : > { %p2281_p6 = pnand %p2280_p2, %p2274_p12 }
 0x1ae   : > { %2284 = shalt.err (!%p2281_p6)
}
 0x1af   : > { %s2285_s4 = scalar_lea.hbm %s2811_s9, 2048  ;;  %s2289_s11 = scalar_lea.hbm %s2943_s19, 8192 }
 0x1b0   : > { %p2286_p11 = scmp.ne.s32.totalorder %s2811_s9, %s2285_s4  ;;  %p2290_p3 = scmp.lt.s32.totalorder %s2811_s9, %s2943_s19 }
 0x1b1   : > { %p2291_p10 = scmp.lt.s32.totalorder %s2289_s11, %s2285_s4 }
 0x1b2   : > { %p2287_p8 = pnand %p2286_p11, %p2544_p7 }
 0x1b3   : > { %p2292_p4 = por %p2291_p10, %p2290_p3 }
 0x1b4   : > { %p2288_p13 = pneg %p2287_p8 }
 0x1b6   : > { %p2293_p5 = pnand %p2292_p4, %p2288_p13 }
 0x1b8   : > { %2296 = shalt.err (!%p2293_p5)
}
 0x1b9   : > { %2019 = dma.vmem_to_hbm [thread:$0]  (%p2544_p7), %s2813_s28, 2048, %s2811_s9, %s1292_s30, %s2394_s6, %s2394_s6, %s2395_s15  }
 0x1ba PF: > { %s2944_s18 = sld [smem:[#allocation19_spill]]  ;;  %p2048_p9 = scmp.ge.s32.totalorder %s2383_s8, 2 }
 0x1bb   : > { %s2945_s10 = sld [smem:[#allocation22_spill]] }
 0x1c0   : > { %s1340_s14 = sand.u32 1, %s2944_s18  }
 0x1c1   : > { %p2946_p12 = scmp.ne.s32.totalorder %s2945_s10, 0  ;;  %s1341_s27 = scalar_lea.sflag [#allocation4], %s1340_s14 }
 0x1c3   : > { %p2037_p0 = pnand %p2048_p9, %p2946_p12 }
 0x1c5   : > { %p2038_p1 = pneg %p2037_p0 }
 0x1c7   : > { %2346 = dma.done.wait (%p2038_p1), %s1341_s27, 2048  }
 0x1c8   : > { %2348 = vsyncadd (%p2038_p1), %s1341_s27, 4294965248  ;;  %s1350_s17 = scalar_lea.sflag [#allocation12], %s1340_s14 }
 0x1c9   : > { %2350 = dma.done.wait (%p2038_p1), %s1350_s17, 2048  }
 0x1ca   : > { %2352 = vsyncadd (%p2038_p1), %s1350_s17, 4294965248  ;;  %s31_s8 = sadd.s32 1, %s2383_s8   ;;  %s2947_s28 = smov %s2562_s24 }
 0x1cb   : > { %p28_p2 = scmp.ge.s32.totalorder %s31_s8, 6   ;;  %s2948_s12 = sld [smem:[#allocation21_spill]] }
 0x1cc   : > { %s2949_s9 = sld [smem:[#allocation23_spill]]  ;;  %s2951_s24 = smov %s2359_s25 }
 0x1cd   : > { %s2950_s30 = sld [smem:[#allocation25_spill]]  ;;  %s2952_s25 = smov %s2363_s26 }
 0x1ce   : > { %s2953_s26 = smov %s2947_s28  ;;  %s2954_s27 = smov %s2375_s29 }
 0x1cf   :  { %30 = sbr.rel (!%p28_p2) target bundleno = 18 (0x12), region = 127 }
 0x1d1   : > { %s2955_s28 = smov %s2948_s12 }
 0x1d2   : > { %s2956_s29 = smov %s2949_s9 }
 0x1d4   :  { %1355 = vsyncpa [#allocation3], 1 }
 0x1d5   :  { %1357 = vsyncpa [#allocation3 + $0x1], 1 }
 0x1d6   :  { %1358 = vsyncpa [#allocation6], 1 }
 0x1d7   :  { %1360 = vsyncpa [#allocation6 + $0x1], 1 }
 0x1d8   :  { %1361 = vsyncpa [#allocation9], 1 }
 0x1d9   :  { %1362 = vsyncpa [#allocation4], 1 }
 0x1da   :  { %1364 = vsyncpa [#allocation4 + $0x1], 1 }
 0x1db   :  { %1365 = vsyncpa [#allocation12], 1 }
 0x1dc   :  { %1367 = vsyncpa [#allocation12 + $0x1], 1 }

</bundles_post_ra>
